<compile_context>
chip_gen: v5e
topology: v5e:2x2
jax: 0.10.0
libtpu: 0.0.40
codegen_flags: <defaults>
</compile_context>

<pallas_src>
import functools
import math

import jax
import jax.numpy as jnp
from jax.experimental import pallas as pl
from jax.experimental.pallas import tpu as pltpu

LN_EPS = 1e-12
GELU_C = math.sqrt(2.0 / math.pi)
VMEM_LIMIT = 48 * 1024 * 1024   # safe on v5e/v6e (128 MiB phys) and v7x (64 MiB phys)


# ------------------------------- tiling utils -------------------------------


def _pick_tile(dim, preferred, align):
    """Largest divisor of `dim` that is <= `preferred` and a multiple of `align`.

    Falls back to the full dim (which always satisfies the (8,128) block rule).
    """
    if dim <= preferred:
        return dim
    t = (preferred // align) * align
    while t >= align:
        if dim % t == 0:
            return t
        t -= align
    return dim


def _apply_activation(y, activation):
    if activation == "gelu":
        # TODO(synk): original BERT uses erf-GELU; tanh approximation used (Mosaic-friendly).
        return 0.5 * y * (1.0 + jnp.tanh(GELU_C * (y + 0.044715 * y * y * y)))
    if activation == "tanh":
        return jnp.tanh(y)
    return y


def _ln_rows(y, g, b):
    """Row LayerNorm, single-pass statistics (sum & sum-of-squares), f32."""
    inv_n = 1.0 / y.shape[-1]
    s1 = jnp.sum(y, axis=-1, keepdims=True)
    s2 = jnp.sum(y * y, axis=-1, keepdims=True)
    mu = s1 * inv_n
    var = jnp.maximum(s2 * inv_n - mu * mu, 0.0)
    return (y - mu) * jax.lax.rsqrt(var + LN_EPS) * g + b


# --------------------------- dense (+ activation) ----------------------------


def _dense_kernel_1k(x_ref, w_ref, b_ref, o_ref, *, activation):
    # Whole K in one tile: no accumulator scratch, no k axis.
    y = jnp.dot(x_ref[...], w_ref[...], preferred_element_type=jnp.float32) + b_ref[...]
    o_ref[...] = _apply_activation(y, activation).astype(o_ref.dtype)


def _dense_kernel_kloop(x_ref, w_ref, b_ref, o_ref, acc_ref, *, activation):
    k = pl.program_id(1)

    @pl.when(k == 0)
    def _():
        acc_ref[...] = jnp.zeros_like(acc_ref)

    acc_ref[...] += jnp.dot(x_ref[...], w_ref[...], preferred_element_type=jnp.float32)

    @pl.when(k == pl.num_programs(1) - 1)
    def _():
        y = acc_ref[...] + b_ref[...]
        o_ref[...] = _apply_activation(y, activation).astype(o_ref.dtype)


def dense_act(x, w, b, activation="none", out_dtype=jnp.bfloat16):
    """y = act(x @ w + b). x:[M,K] bf16, w:[K,N] bf16, b:[1,N] f32 -> [M,N] out_dtype.

    Full-N output tiles (no j axis), tm up to 512, tk up to 1024.
    """
    M, K = x.shape
    N = w.shape[1]
    tm = _pick_tile(M, 512, 8)
    tk = _pick_tile(K, 1024, 128)
    nk = K // tk
    cost = pl.CostEstimate(
        flops=2 * M * N * K,
        transcendentals=(M * N) if activation != "none" else 0,
        bytes_accessed=2 * M * K + 2 * K * N + 2 * M * N + 4 * N)
    cp = pltpu.CompilerParams(
        dimension_semantics=("parallel",) if nk == 1 else ("parallel", "arbitrary"),
        vmem_limit_bytes=VMEM_LIMIT)
    if nk == 1:
        return pl.pallas_call(
            functools.partial(_dense_kernel_1k, activation=activation),
            out_shape=jax.ShapeDtypeStruct((M, N), out_dtype),
            grid_spec=pltpu.PrefetchScalarGridSpec(
                num_scalar_prefetch=0, grid=(M // tm,),
                in_specs=[
                    pl.BlockSpec((tm, K), lambda i: (i, 0)),
                    pl.BlockSpec((K, N), lambda i: (0, 0)),   # resident across i
                    pl.BlockSpec((1, N), lambda i: (0, 0)),
                ],
                out_specs=pl.BlockSpec((tm, N), lambda i: (i, 0))),
            compiler_params=cp, cost_estimate=cost,
        )(x, w, b)
    return pl.pallas_call(
        functools.partial(_dense_kernel_kloop, activation=activation),
        out_shape=jax.ShapeDtypeStruct((M, N), out_dtype),
        grid_spec=pltpu.PrefetchScalarGridSpec(
            num_scalar_prefetch=0, grid=(M // tm, nk),
            in_specs=[
                pl.BlockSpec((tm, tk), lambda i, k: (i, k)),
                pl.BlockSpec((tk, N), lambda i, k: (k, 0)),
                pl.BlockSpec((1, N), lambda i, k: (0, 0)),
            ],
            out_specs=pl.BlockSpec((tm, N), lambda i, k: (i, 0)),
            scratch_shapes=[pltpu.VMEM((tm, N), jnp.float32)]),
        compiler_params=cp, cost_estimate=cost,
    )(x, w, b)


# ------------------- dense + residual-add + LayerNorm fused ------------------


def _dense_ln_kernel_1k(x_ref, w_ref, b_ref, res_ref, g_ref, bb_ref, o_ref):
    y = jnp.dot(x_ref[...], w_ref[...], preferred_element_type=jnp.float32)
    y = y + b_ref[...] + res_ref[...].astype(jnp.float32)
    o_ref[...] = _ln_rows(y, g_ref[...], bb_ref[...]).astype(o_ref.dtype)


def _dense_ln_kernel_kloop(x_ref, w_ref, b_ref, res_ref, g_ref, bb_ref, o_ref, acc_ref):
    k = pl.program_id(1)

    @pl.when(k == 0)
    def _():
        acc_ref[...] = jnp.zeros_like(acc_ref)

    acc_ref[...] += jnp.dot(x_ref[...], w_ref[...], preferred_element_type=jnp.float32)

    @pl.when(k == pl.num_programs(1) - 1)
    def _():
        y = acc_ref[...] + b_ref[...] + res_ref[...].astype(jnp.float32)
        o_ref[...] = _ln_rows(y, g_ref[...], bb_ref[...]).astype(o_ref.dtype)


def dense_add_layernorm(x, w, b, residual, gamma, beta, out_dtype=jnp.bfloat16):
    """LayerNorm(x @ w + b + residual) over the last dim (eps=1e-12).

    Full-N row tiles so the LN row statistics stay in the matmul epilogue;
    no separate add+LN HBM round trip.
    """
    M, K = x.shape
    N = w.shape[1]
    tm = _pick_tile(M, 512, 8)
    tk = _pick_tile(K, 1024, 128)
    nk = K // tk
    cost = pl.CostEstimate(
        flops=2 * M * N * K + 10 * M * N,
        transcendentals=M,
        bytes_accessed=2 * M * K + 2 * K * N + 4 * M * N + 12 * N)
    cp = pltpu.CompilerParams(
        dimension_semantics=("parallel",) if nk == 1 else ("parallel", "arbitrary"),
        vmem_limit_bytes=VMEM_LIMIT)
    if nk == 1:
        return pl.pallas_call(
            _dense_ln_kernel_1k,
            out_shape=jax.ShapeDtypeStruct((M, N), out_dtype),
            grid_spec=pltpu.PrefetchScalarGridSpec(
                num_scalar_prefetch=0, grid=(M // tm,),
                in_specs=[
                    pl.BlockSpec((tm, K), lambda i: (i, 0)),
                    pl.BlockSpec((K, N), lambda i: (0, 0)),
                    pl.BlockSpec((1, N), lambda i: (0, 0)),
                    pl.BlockSpec((tm, N), lambda i: (i, 0)),
                    pl.BlockSpec((1, N), lambda i: (0, 0)),
                    pl.BlockSpec((1, N), lambda i: (0, 0)),
                ],
                out_specs=pl.BlockSpec((tm, N), lambda i: (i, 0))),
            compiler_params=cp, cost_estimate=cost,
        )(x, w, b, residual, gamma, beta)
    return pl.pallas_call(
        _dense_ln_kernel_kloop,
        out_shape=jax.ShapeDtypeStruct((M, N), out_dtype),
        grid_spec=pltpu.PrefetchScalarGridSpec(
            num_scalar_prefetch=0, grid=(M // tm, nk),
            in_specs=[
                pl.BlockSpec((tm, tk), lambda i, k: (i, k)),
                pl.BlockSpec((tk, N), lambda i, k: (k, 0)),
                pl.BlockSpec((1, N), lambda i, k: (0, 0)),
                pl.BlockSpec((tm, N), lambda i, k: (i, 0)),
                pl.BlockSpec((1, N), lambda i, k: (0, 0)),
                pl.BlockSpec((1, N), lambda i, k: (0, 0)),
            ],
            out_specs=pl.BlockSpec((tm, N), lambda i, k: (i, 0)),
            scratch_shapes=[pltpu.VMEM((tm, N), jnp.float32)]),
        compiler_params=cp, cost_estimate=cost,
    )(x, w, b, residual, gamma, beta)


# ------------------ embedding sum + LayerNorm (fused, no emb HBM pass) -------


def _emb_ln_kernel(w_ref, pt_ref, g_ref, b_ref, o_ref):
    y = w_ref[0] + pt_ref[0]                                   # [ts, H] f32
    o_ref[0] = _ln_rows(y, g_ref[...], b_ref[...]).astype(o_ref.dtype)


def embed_layernorm(word, pos_type, gamma, beta, out_dtype=jnp.bfloat16):
    """LayerNorm(word + pos_type); word:[B,S,H] f32, pos_type:[1,S,H] f32 -> bf16."""
    B, S, H = word.shape
    ts = _pick_tile(S, 512, 8)
    return pl.pallas_call(
        _emb_ln_kernel,
        out_shape=jax.ShapeDtypeStruct((B, S, H), out_dtype),
        grid_spec=pltpu.PrefetchScalarGridSpec(
            num_scalar_prefetch=0, grid=(B, S // ts),
            in_specs=[
                pl.BlockSpec((1, ts, H), lambda b, i: (b, i, 0)),
                pl.BlockSpec((1, ts, H), lambda b, i: (0, i, 0)),
                pl.BlockSpec((1, H), lambda b, i: (0, 0)),
                pl.BlockSpec((1, H), lambda b, i: (0, 0)),
            ],
            out_specs=pl.BlockSpec((1, ts, H), lambda b, i: (b, i, 0))),
        compiler_params=pltpu.CompilerParams(
            dimension_semantics=("parallel", "parallel"),
            vmem_limit_bytes=VMEM_LIMIT),
    )(word, pos_type, gamma, beta)


# --------------------------------- attention ---------------------------------


def _attention_kernel(qkv_ref, bias_ref, o_ref, *, n_heads, head_dim, scale):
    H = n_heads * head_dim
    x = qkv_ref[0]                                       # [S, 3H] bf16 (this batch elem)
    S = x.shape[0]
    # Hoist the [1,S] -> [S,S] mask-bias broadcast out of the per-head loop
    # (JAX does not CSE broadcast_in_dim).
    bias_b = jnp.broadcast_to(bias_ref[0], (S, S))       # f32

    def head_ctx(h):
        lo = h * head_dim
        qh = x[:, lo:lo + head_dim] * scale              # 1/sqrt(d) folded into Q (bf16)
        kh = x[:, H + lo:H + lo + head_dim]
        vh = x[:, 2 * H + lo:2 * H + lo + head_dim]
        s = jax.lax.dot_general(qh, kh, (((1,), (1,)), ((), ())),
                                preferred_element_type=jnp.float32)   # [S, S] f32
        s = s + bias_b
        m = jnp.max(s, axis=-1, keepdims=True)
        p = jnp.exp(s - m)
        denom = jnp.sum(p, axis=-1, keepdims=True)
        p = (p * pl.reciprocal(denom, approx=True)).astype(jnp.bfloat16)
        return jnp.dot(p, vh, preferred_element_type=jnp.float32)     # [S, hd] f32

    # Heads processed in pairs; each pair's [S, 2*hd] result is stored as soon
    # as it is produced (128-lane aligned for head_dim=64) -> bounded live
    # ranges, no n_heads-wide concatenate, lane-dense stores.
    for pr in range(n_heads // 2):
        lo = 2 * pr * head_dim
        pair = jnp.concatenate([head_ctx(2 * pr), head_ctx(2 * pr + 1)], axis=-1)
        o_ref[0, :, lo:lo + 2 * head_dim] = pair.astype(o_ref.dtype)
    if n_heads % 2:
        h = n_heads - 1
        o_ref[0, :, h * head_dim:(h + 1) * head_dim] = head_ctx(h).astype(o_ref.dtype)


def attention(qkv, bias, *, n_heads, head_dim):
    """qkv: [B, S, 3H] bf16 (q|k|v); bias: [B, 1, S] additive mask -> [B, S, H] bf16.

    Grid over batch (parallel); one batch element's Q/K/V plus one [S,S] score
    tile resident in VMEM; the [B*heads, S, S] bias is never materialized.
    """
    # TODO(synk): for long S add flash-style q/kv tiling (online softmax) and a
    # head-pair grid axis so v7x's two TensorCores stay busy at small batch.
    B, S, threeH = qkv.shape
    H = threeH // 3
    cost = pl.CostEstimate(
        flops=4 * B * n_heads * S * S * head_dim,
        transcendentals=B * n_heads * S * S,
        bytes_accessed=2 * B * S * (3 * H + H) + 4 * B * S)
    return pl.pallas_call(
        functools.partial(_attention_kernel, n_heads=n_heads,
                          head_dim=head_dim, scale=1.0 / math.sqrt(head_dim)),
        out_shape=jax.ShapeDtypeStruct((B, S, H), jnp.bfloat16),
        grid_spec=pltpu.PrefetchScalarGridSpec(
            num_scalar_prefetch=0, grid=(B,),
            in_specs=[pl.BlockSpec((1, S, threeH), lambda b: (b, 0, 0)),
                      pl.BlockSpec((1, 1, S), lambda b: (b, 0, 0))],
            out_specs=pl.BlockSpec((1, S, H), lambda b: (b, 0, 0))),
        compiler_params=pltpu.CompilerParams(
            dimension_semantics=("parallel",), vmem_limit_bytes=VMEM_LIMIT),
        cost_estimate=cost,
    )(qkv, bias)


# ------------------------------- BERT assembly -------------------------------


def init_params(key, *, vocab_size, hidden, n_layers, intermediate, max_pos, type_vocab):
    keys = iter(jax.random.split(key, 4 + 4 * n_layers))

    def nrm(shape):
        return 0.02 * jax.random.normal(next(keys), shape, jnp.float32)

    params = {
        "word_emb": nrm((vocab_size, hidden)),
        "pos_emb": nrm((max_pos, hidden)),
        "type_emb": nrm((type_vocab, hidden)),
        "emb_ln_g": jnp.ones((1, hidden), jnp.float32),
        "emb_ln_b": jnp.zeros((1, hidden), jnp.float32),
        "pool_w": nrm((hidden, hidden)).astype(jnp.bfloat16),
        "pool_b": jnp.zeros((1, hidden), jnp.float32),
        "layers": [],
    }
    for _ in range(n_layers):
        params["layers"].append({
            # fused QKV projection weight: [H, 3H] = (Wq | Wk | Wv)
            "qkv_w": nrm((hidden, 3 * hidden)).astype(jnp.bfloat16),
            "qkv_b": jnp.zeros((1, 3 * hidden), jnp.float32),
            "ao_w": nrm((hidden, hidden)).astype(jnp.bfloat16),
            "ao_b": jnp.zeros((1, hidden), jnp.float32),
            "ao_ln_g": jnp.ones((1, hidden), jnp.float32),
            "ao_ln_b": jnp.zeros((1, hidden), jnp.float32),
            "ff1_w": nrm((hidden, intermediate)).astype(jnp.bfloat16),
            "ff1_b": jnp.zeros((1, intermediate), jnp.float32),
            "ff2_w": nrm((intermediate, hidden)).astype(jnp.bfloat16),
            "ff2_b": jnp.zeros((1, hidden), jnp.float32),
            "ff_ln_g": jnp.ones((1, hidden), jnp.float32),
            "ff_ln_b": jnp.zeros((1, hidden), jnp.float32),
        })
    return params


def model_forward(params, context, mask, *, n_heads):
    """Equivalent of Model.forward(x) -> pooled_last_layer."""
    B, S = context.shape
    H = params["word_emb"].shape[1]
    hd = H // n_heads

    # --- embeddings (gather is glue; sum + LN fused in-kernel) ---
    word = jnp.take(params["word_emb"], context, axis=0)            # [B, S, H] f32
    pos_type = (params["pos_emb"][:S]
                + params["type_emb"][0][None, :])[None]             # [1, S, H] (type=0)
    x2 = embed_layernorm(word, pos_type, params["emb_ln_g"],
                         params["emb_ln_b"]).reshape(B * S, H)      # [B*S, H] bf16

    # additive attention mask bias, kept at its natural [B, 1, S] size
    bias = ((1.0 - mask.astype(jnp.float32)) * -10000.0).reshape(B, 1, S)

    for l in params["layers"]:
        qkv = dense_act(x2, l["qkv_w"], l["qkv_b"])                 # [B*S, 3H] bf16
        ctx = attention(qkv.reshape(B, S, 3 * H), bias,
                        n_heads=n_heads, head_dim=hd)               # [B, S, H] bf16
        x2 = dense_add_layernorm(ctx.reshape(B * S, H), l["ao_w"], l["ao_b"],
                                 x2, l["ao_ln_g"], l["ao_ln_b"])    # attn out + LN
        ff = dense_act(x2, l["ff1_w"], l["ff1_b"], activation="gelu")
        x2 = dense_add_layernorm(ff, l["ff2_w"], l["ff2_b"],
                                 x2, l["ff_ln_g"], l["ff_ln_b"])    # FF2 + LN

    last_hidden = x2.reshape(B, S, H)
    cls = last_hidden[:, 0, :]                                      # [B, H] bf16
    pooled = dense_act(cls, params["pool_w"], params["pool_b"],
                       activation="tanh", out_dtype=jnp.float32)
    return pooled                                                   # [B, H] f32


# ----------------------------------- main ------------------------------------

if __name__ == "__main__":
    VOCAB, HIDDEN, LAYERS, HEADS, INTER, MAX_POS, TYPE_VOCAB = 100, 32, 2, 4, 64, 16, 2
    B, S = 2, 8

    root = jax.random.PRNGKey(0)
    k_param, k_tok = jax.random.split(root)
    params = init_params(k_param, vocab_size=VOCAB, hidden=HIDDEN, n_layers=LAYERS,
                         intermediate=INTER, max_pos=MAX_POS, type_vocab=TYPE_VOCAB)

    context = jax.random.randint(k_tok, (B, S), 0, VOCAB, dtype=jnp.int32)
    mask = jnp.ones((B, S), jnp.float32).at[1, 6:].set(0.0)         # pad last 2 of seq 1

    pooled = model_forward(params, context, mask, n_heads=HEADS)
    jax.block_until_ready(pooled)
    assert pooled.shape == (B, HIDDEN) and pooled.dtype == jnp.float32
    print("KERNEL_OK")
</pallas_src>

<mosaic_0001>
module attributes {stable_mosaic.version = 11 : i64} {
  func.func @_emb_ln_kernel(%arg0: i32, %arg1: i32, %arg2: memref<1x8x32xf32, #tpu.memory_space<vmem>>, %arg3: memref<1x8x32xf32, #tpu.memory_space<vmem>>, %arg4: memref<1x32xf32, #tpu.memory_space<vmem>>, %arg5: memref<1x32xf32, #tpu.memory_space<vmem>>, %arg6: memref<1x8x32xbf16, #tpu.memory_space<vmem>>) attributes {dimension_semantics = [#tpu.dimension_semantics<parallel>, #tpu.dimension_semantics<parallel>], iteration_bounds = array<i64: 2, 1>, scalar_prefetch = 0 : i64, scratch_operands = 0 : i64, tpu.core_type = #tpu.core_type<tc>, window_params = [{transform_indices = @transform_0, window_bounds = array<i64: 1, 8, 32>}, {transform_indices = @transform_1, window_bounds = array<i64: 1, 8, 32>}, {pipeline_mode = #tpu.pipeline_mode<synchronous>, transform_indices = @transform_2, window_bounds = array<i64: 1, 32>}, {pipeline_mode = #tpu.pipeline_mode<synchronous>, transform_indices = @transform_3, window_bounds = array<i64: 1, 32>}, {transform_indices = @transform_4, window_bounds = array<i64: 1, 8, 32>}]} {
    %c0 = arith.constant 0 : index
    %c0_0 = arith.constant 0 : index
    %c0_1 = arith.constant 0 : index
    %0 = vector.load %arg2[%c0, %c0_0, %c0_1] : memref<1x8x32xf32, #tpu.memory_space<vmem>>, vector<1x8x32xf32>
    %1 = vector.shape_cast %0 : vector<1x8x32xf32> to vector<8x32xf32>
    %c0_2 = arith.constant 0 : index
    %c0_3 = arith.constant 0 : index
    %c0_4 = arith.constant 0 : index
    %2 = vector.load %arg3[%c0_2, %c0_3, %c0_4] : memref<1x8x32xf32, #tpu.memory_space<vmem>>, vector<1x8x32xf32>
    %3 = vector.shape_cast %2 : vector<1x8x32xf32> to vector<8x32xf32>
    %4 = arith.addf %1, %3 : vector<8x32xf32>
    %c0_5 = arith.constant 0 : index
    %c0_6 = arith.constant 0 : index
    %5 = vector.load %arg4[%c0_5, %c0_6] : memref<1x32xf32, #tpu.memory_space<vmem>>, vector<1x32xf32>
    %c0_7 = arith.constant 0 : index
    %c0_8 = arith.constant 0 : index
    %6 = vector.load %arg5[%c0_7, %c0_8] : memref<1x32xf32, #tpu.memory_space<vmem>>, vector<1x32xf32>
    %cst = arith.constant dense<0.000000e+00> : vector<8xf32>
    %7 = vector.multi_reduction <add>, %4, %cst [1] : vector<8x32xf32> to vector<8xf32>
    %8 = vector.shape_cast %7 : vector<8xf32> to vector<8x1xf32>
    %9 = arith.mulf %4, %4 : vector<8x32xf32>
    %cst_9 = arith.constant dense<0.000000e+00> : vector<8xf32>
    %10 = vector.multi_reduction <add>, %9, %cst_9 [1] : vector<8x32xf32> to vector<8xf32>
    %11 = vector.shape_cast %10 : vector<8xf32> to vector<8x1xf32>
    %cst_10 = arith.constant 3.125000e-02 : f32
    %12 = vector.broadcast %cst_10 : f32 to vector<8x1xf32>
    %13 = arith.mulf %8, %12 : vector<8x1xf32>
    %cst_11 = arith.constant 3.125000e-02 : f32
    %14 = vector.broadcast %cst_11 : f32 to vector<8x1xf32>
    %15 = arith.mulf %11, %14 : vector<8x1xf32>
    %16 = arith.mulf %13, %13 : vector<8x1xf32>
    %17 = arith.subf %15, %16 : vector<8x1xf32>
    %cst_12 = arith.constant 0.000000e+00 : f32
    %18 = vector.broadcast %cst_12 : f32 to vector<8x1xf32>
    %19 = arith.maximumf %17, %18 : vector<8x1xf32>
    %20 = vector.broadcast %13 : vector<8x1xf32> to vector<8x32xf32>
    %21 = arith.subf %4, %20 : vector<8x32xf32>
    %cst_13 = arith.constant 9.99999996E-13 : f32
    %22 = vector.broadcast %cst_13 : f32 to vector<8x1xf32>
    %23 = arith.addf %19, %22 : vector<8x1xf32>
    %24 = math.rsqrt %23 : vector<8x1xf32>
    %25 = vector.broadcast %24 : vector<8x1xf32> to vector<8x32xf32>
    %26 = arith.mulf %21, %25 : vector<8x32xf32>
    %27 = vector.broadcast %5 : vector<1x32xf32> to vector<8x32xf32>
    %28 = arith.mulf %26, %27 : vector<8x32xf32>
    %29 = vector.broadcast %6 : vector<1x32xf32> to vector<8x32xf32>
    %30 = arith.addf %28, %29 : vector<8x32xf32>
    %31 = arith.truncf %30 : vector<8x32xf32> to vector<8x32xbf16>
    %c0_14 = arith.constant 0 : index
    %c0_15 = arith.constant 0 : index
    %c0_16 = arith.constant 0 : index
    %32 = vector.load %arg6[%c0_14, %c0_15, %c0_16] : memref<1x8x32xbf16, #tpu.memory_space<vmem>>, vector<1x8x32xbf16>
    %33 = vector.shape_cast %32 : vector<1x8x32xbf16> to vector<8x32xbf16>
    %34 = vector.shape_cast %31 : vector<8x32xbf16> to vector<1x8x32xbf16>
    tpu.vector_store %arg6[%c0_14, %c0_15, %c0_16], %34 {strides = array<i32>} : memref<1x8x32xbf16, #tpu.memory_space<vmem>>, vector<1x8x32xbf16>,
    return
  }
  func.func @transform_0(%arg0: i32, %arg1: i32) -> (i32, i32, i32) {
    %c0_i32 = arith.constant 0 : i32
    %c0_i32_0 = arith.constant 0 : i32
    return %arg0, %arg1, %c0_i32 : i32, i32, i32
  }
  func.func @transform_1(%arg0: i32, %arg1: i32) -> (i32, i32, i32) {
    %c0_i32 = arith.constant 0 : i32
    %c0_i32_0 = arith.constant 0 : i32
    %c0_i32_1 = arith.constant 0 : i32
    return %c0_i32, %arg1, %c0_i32_0 : i32, i32, i32
  }
  func.func @transform_2(%arg0: i32, %arg1: i32) -> (i32, i32) {
    %c0_i32 = arith.constant 0 : i32
    %c0_i32_0 = arith.constant 0 : i32
    %c0_i32_1 = arith.constant 0 : i32
    return %c0_i32, %c0_i32_0 : i32, i32
  }
  func.func @transform_3(%arg0: i32, %arg1: i32) -> (i32, i32) {
    %c0_i32 = arith.constant 0 : i32
    %c0_i32_0 = arith.constant 0 : i32
    %c0_i32_1 = arith.constant 0 : i32
    return %c0_i32, %c0_i32_0 : i32, i32
  }
  func.func @transform_4(%arg0: i32, %arg1: i32) -> (i32, i32, i32) {
    %c0_i32 = arith.constant 0 : i32
    %c0_i32_0 = arith.constant 0 : i32
    return %arg0, %arg1, %c0_i32 : i32, i32, i32
  }
}

</mosaic_0001>

<bundles_post_ra>
// kernel: tpu_custom_call.1
= control target key start
LH: loop header
LB: loop body
LE: loop exit
PB: predicated region body
PF: predicated region fallthrough
CT: control target
= control target key end

     0   :  { %9 = vsyncpa [#allocation3], 0  ;;  %s827_s0 = inlined_call_operand.hbm [shape: f32[2,8,32], index: 0, kind: input, shape index: {}]   ;;  %s828_s1 = inlined_call_operand.hbm [shape: f32[1,8,32], index: 1, kind: input, shape index: {}]   ;;  %s829_s2 = inlined_call_operand.vmem [shape: f32[1,32], index: 2, kind: input, shape index: {}]   ;;  %s830_s3 = inlined_call_operand.vmem [shape: f32[1,32], index: 3, kind: input, shape index: {}]   ;;  %s831_s4 = inlined_call_operand.hbm [shape: bf16[2,8,32], index: 4, kind: output, shape index: {}]  }
   0x1   :  { %11 = vsyncpa [#allocation3 + $0x1], 0 }
   0x2   :  { %12 = vsyncpa [#allocation6], 0 }
   0x3   :  { %13 = vsyncpa [#allocation4], 0 }
   0x4   :  { %15 = vsyncpa [#allocation4 + $0x1], 0  ;;  %s671_s15 = smov 0   ;;  %s673_s16 = smov 0  }
   0x5   :  { %s675_s17 = smov 0   ;;  %s677_s18 = smov 0  }
   0x6   :  { %s679_s19 = smov 0   ;;  %s681_s20 = smov 0  }
   0x7 LB: > { %s405_s21 = sadd.s32 4294967295, %s643_s20   ;;  %s406_s22 = sadd.s32 4294967294, %s643_s20   ;;  %s643_s20 = sphi %s681_s20, %s21_s20   ;;  %s639_s19 = sphi %s679_s19, %s843_s19   ;;  %s635_s18 = sphi %s677_s18, %s842_s18   ;;  %s631_s17 = sphi %s675_s17, %s841_s17   ;;  %s627_s16 = sphi %s673_s16, %s840_s16   ;;  %s623_s15 = sphi %s671_s15, %s839_s15  }
   0x8   : > { %p55_p0 = scmp.ne.s32.totalorder %s627_s16, %s623_s15  ;;  %p705_p1 = scmp.eq.s32.totalorder %s405_s21, 0 }
   0x9   : > { %p709_p2 = scmp.eq.s32.totalorder %s405_s21, 1  ;;  %p155_p3 = scmp.eq.s32.totalorder %s406_s22, 1 }
   0xa   : > { %p715_p4 = por %p705_p1, %p55_p0  ;;  %p407_p5 = scmp.ge.s32.totalorder %s643_s20, 1 }
   0xb   : > { %p720_p6 = por %p155_p3, %p55_p0  ;;  %p162_p7 = scmp.lt.s32.totalorder %s643_s20, 3 }
   0xc   : > { %s176_s29 = sshll.u32 %s828_s1, 4  ;;  %p409_p9 = scmp.ge.s32.totalorder %s643_s20, 2  ;;  %s177_s29 = int_to_ptr.hbm [resolvable:$true] %s176_s29 }
   0xd   : > { %p728_p8 = pnand %p407_p5, %p162_p7  ;;  %s645_s5 = smov [#allocation5]  }
   0xe   : > { %s178_s6 = sshll.u32 %s645_s5, 4  ;;  %s33_s7 = sadd.s32 1, %s639_s19  ;;  %s179_s6 = int_to_ptr.vmem [resolvable:$true] %s178_s6 }
   0xf   : > { %p428_p10 = pneg %p728_p8  ;;  %p35_p12 = scmp.ge.s32.totalorder %s33_s7, 2 }
  0x10   : > { %s42_s8 = sadd.s32 1, %s631_s17  ;;  %p49_p13 = scmp.ne.s32.totalorder %s631_s17, %s627_s16 }
  0x11   : > { %p429_p11 = pnand %p428_p10, %p705_p1  ;;  %p50_p0 = scmp.eq.s32.totalorder %s643_s20, 0 }
  0x12   : > { %s845_s7 = smov (%p35_p12, %s33_s7), 0  ;;  %p750_p5 = por %p709_p2, %p49_p13 }
  0x13   : > { %431 = dma.hbm_to_vmem [thread:$0]  (!%p429_p11), %s177_s29, 128, %s179_s6, [#allocation6]  }
  0x14   : > { %p744_p3 = por %p50_p0, %p49_p13  ;;  %s37_s11 = ssub.s32 %s639_s19, %s845_s7 }
  0x15   : > { %p441_p7 = scmp.lt.s32.totalorder %s643_s20, 2  ;;  %p40_p10 = scmp.eq.s32.totalorder %s37_s11, 0 }
  0x16   : > { %s195_s12 = sand.u32 1, %s631_s17   ;;  %s411_s21 = sshll.u32 %s639_s19, 3 }
  0x17   : > { %s410_s13 = sshll.u32 %s195_s12, 3  ;;  %s204_s28 = scalar_lea.hbm %s827_s0, %s411_s21 }
  0x18   : > { %s759_s14 = scalar_select %p40_p10, %s631_s17, %s42_s8  }
  0x19   : > { %s199_s29 = scalar_lea.vmem [#allocation2], %s410_s13  ;;  %s206_s24 = sshll.u32 %s204_s28, 4  ;;  %s207_s24 = int_to_ptr.hbm [resolvable:$true] %s206_s24 }
  0x1a   : > { %s208_s5 = sshll.u32 %s199_s29, 4  ;;  %p433_p2 = pnand %p441_p7, %p744_p3  ;;  %s209_s5 = int_to_ptr.vmem [resolvable:$true] %s208_s5 }
  0x1b   : > { %s196_s6 = scalar_lea.sflag [#allocation3], %s195_s12  ;;  %217 = sbr.rel (%p728_p8) target bundleno = 200 (0xc8), region = 36 }
  0x1c   : > { %435 = dma.hbm_to_vmem [thread:$0]  (!%p433_p2), %s207_s24, 128, %s209_s5, %s196_s6  }
  0x1d   : > { %s770_s8 = sand.u32 (!%p728_p8), 1, %s627_s16  }
  0x1e   : > { %s413_s11 = sshll.u32 (!%p728_p8), %s770_s8, 3  ;;  %s220_s21 = scalar_lea.sflag (!%p728_p8), [#allocation3], %s770_s8 }
  0x1f   : > { %s223_s13 = scalar_lea.vmem (!%p728_p8), [#allocation2], %s413_s11 }
  0x20   : > { %610 = dma.done.wait (%p715_p4), %s220_s21, 128  }
  0x21   : > { %612 = vsyncadd (%p715_p4), %s220_s21, 4294967168 }
  0x22   : > { %614 = dma.done.wait (%p705_p1), [#allocation6], 128  }
  0x23   : > { %616 = vsyncadd (%p705_p1), [#allocation6], 4294967168  ;;  %v254_v0 = vld [vmem:[%s223_s13] sm:$0xff]  ;;  %v255_v1 = vld [vmem:[#allocation5] sm:$0xff]  ;;  %vm259_vm0 = vcmask 261120   ;;  %s415_s23 = sshll.u32 %s770_s8, 2 }
  0x24   : > { %v256_v2 = vadd.f32 %v255_v1, %v254_v0  ;;  %s417_s25 = sshll.u32 %s635_s18, 2  ;;  %v493_v21 = vld [vmem:[%s829_s2] ss:$0 sm:$0xff]  ;;  %s253_s18 = scalar_lea.vmem [#allocation7], %s415_s23  ;;  %vm294_vm4 = vcmask 257024  }
  0x25   : > { %v494_v24 = vld [vmem:[%s830_s3] ss:$0 sm:$0xff]  ;;  %s308_s29 = scalar_lea.hbm %s831_s4, %s417_s25  ;;  %s310_s5 = sshll.u32 %s253_s18, 4  ;;  %s311_s5 = int_to_ptr.vmem [resolvable:$true] %s310_s5 }
  0x26   : > { %v260_v3 = vsel %vm259_vm0, %v256_v2, 0.0  ;;  %v263_v4 = vmul.f32 %v256_v2, %v256_v2  ;;  %s312_s24 = sshll.u32 %s308_s29, 4  ;;  %s297_s6 = scalar_lea.sflag [#allocation4], %s770_s8  ;;  %s313_s24 = int_to_ptr.hbm [resolvable:$true] %s312_s24 }
  0x27   : > { %261 = vadd.xlane.f32.xlu0 %v260_v3  ;;  %s571_s11 = sshra.s32 %s313_s24, 4  ;;  %s577_s23 = scalar_lea.hbm %s831_s4, 8  ;;  %s572_s11 = int_to_ptr.hbm [resolvable:$true] %s571_s11 }
  0x28   : > { %v264_v5 = vsel %vm259_vm0, %v263_v4, 0.0  ;;  %s573_s21 = scalar_lea.hbm %s572_s11, 4  ;;  %p578_p11 = scmp.lt.s32.totalorder %s572_s11, %s831_s4 }
  0x29   : > { %p574_p1 = scmp.ne.s32.totalorder %s572_s11, %s573_s21  ;;  %p579_p12 = scmp.lt.s32.totalorder %s577_s23, %s573_s21 }
  0x2b   : > { %p575_p4 = pnand %p574_p1, %p750_p5  ;;  %p580_p13 = por %p579_p12, %p578_p11 }
  0x2d   : > { %p576_p8 = pneg %p575_p4 }
  0x2f   : > { %265 = vadd.xlane.f32.xlu0 %v264_v5  ;;  %p581_p0 = pnand %p580_p13, %p576_p8 }
  0x9a   : > { %v262_v6 = vpop.xlane.xlu0 %261 }
  0x9b   : > { %v267_v7 = vmul.f32 0.03125, %v262_v6 }
  0x9d   : > { %v269_v9 = vmul.f32 %v267_v7, %v267_v7  ;;  %v272_v20 = vsub.f32 %v256_v2, %v267_v7 }
  0xa2   : > { %v266_v8 = vpop.xlane.xlu0 %265 }
  0xa3   : > { %v268_v10 = vmul.f32 0.03125, %v266_v8 }
  0xa5   : > { %v270_v11 = vsub.f32 %v268_v10, %v269_v9 }
  0xa7   : > { %v271_v12 = vmax.f32 %v270_v11, 0.0 }
  0xa9   : > { %v273_v13 = vadd.f32 1e-12, %v271_v12 }
  0xab   : > { %495 = vrsqrt.f32 %v273_v13  ;;  %vm280_vm2 = vweird.f32 %v273_v13 }
  0xb1   : > { %v496_v14 = vpop.eup %495 }
  0xb2   : > { %v275_v15 = vmul.f32 %v496_v14, %v273_v13  ;;  %vm281_vm1 = vweird.f32 %v496_v14 }
  0xb3   : > { %vm282_vm3 = vmor %vm280_vm2, %vm281_vm1 }
  0xb4   : > { %v276_v16 = vmul.f32 %v496_v14, %v275_v15 }
  0xb6   : > { %v277_v17 = vmul.f32 0.5, %v276_v16 }
  0xb8   : > { %v278_v18 = vsub.f32 1.5, %v277_v17 }
  0xba   : > { %v279_v19 = vmul.f32 %v496_v14, %v278_v18 }
  0xbc   : > { %v283_v22 = vsel %vm282_vm3, %v496_v14, %v279_v19 }
  0xbd   : > { %v284_v23 = vmul.f32 %v283_v22, %v272_v20 }
  0xbf   : > { %v288_v25 = vmul.f32 %v493_v21, %v284_v23 }
  0xc1   : > { %v292_v26 = vadd.f32 %v494_v24, %v288_v25 }
  0xc3   : > { %v293_v27 = vpack.c.bf16 %v292_v26, %v292_v26 }
  0xc5   : > { %295 = vst.msk [vmem:[%s253_s18] sm:$0xf] %vm294_vm4, %v293_v27 }
  0xc6   : > { %584 = shalt.err (!%p581_p0)
}
  0xc7   : > { %426 = dma.vmem_to_hbm [thread:$0]  (%p750_p5), %s311_s5, 64, %s313_s24, %s297_s6  }
  0xc8 PF: > { %s324_s8 = sand.u32 1, %s623_s15   ;;  %p437_p3 = pnand %p409_p9, %p720_p6 }
  0xc9   : > { %s325_s12 = scalar_lea.sflag [#allocation4], %s324_s8 }
  0xca   : > { %p438_p7 = pneg %p437_p3 }
  0xcc   : > { %618 = dma.done.wait (%p438_p7), %s325_s12, 64  }
  0xcd   : > { %620 = vsyncadd (%p438_p7), %s325_s12, 4294967232  ;;  %s21_s20 = sadd.s32 1, %s643_s20   ;;  %s839_s15 = smov %s627_s16 }
  0xce   : > { %p18_p10 = scmp.ge.s32.totalorder %s21_s20, 4   ;;  %s840_s16 = smov %s631_s17 }
  0xcf   : > { %s841_s17 = smov %s759_s14  ;;  %s842_s18 = smov %s639_s19 }
  0xd0   : > { %s843_s19 = smov %s845_s7  ;;  %20 = sbr.rel (!%p18_p10) target bundleno = 7 (0x7), region = 86 }
  0xd5   :  { %331 = vsyncpa [#allocation3], 1 }
  0xd6   :  { %333 = vsyncpa [#allocation3 + $0x1], 1 }
  0xd7   :  { %334 = vsyncpa [#allocation6], 1 }
  0xd8   :  { %335 = vsyncpa [#allocation4], 1 }
  0xd9   :  { %337 = vsyncpa [#allocation4 + $0x1], 1 }

</bundles_post_ra>
